<compile_context>
chip_gen: v5e
topology: v5e:2x2
jax: 0.10.0
libtpu: 0.0.40
codegen_flags: <defaults>
</compile_context>

<pallas_src>
import functools

import jax
import jax.numpy as jnp
from jax import lax
from jax.experimental import pallas as pl
from jax.experimental.pallas import tpu as pltpu


def _pick_q_tile(n):
    # Keep the whole sequence per grid step for typical (small) GNT sequence
    # lengths; for long sequences tile queries in 128-aligned chunks so the
    # per-step VMEM footprint ((TQ, N) scores, (TQ, D) activations) stays
    # bounded and the grid has more parallel steps (helps v7x's 2 TensorCores).
    if n <= 512:
        return n
    for t in (512, 384, 256, 128):
        if n % t == 0:
            return t
    return n


def _attention_kernel(*refs, n_heads, head_dim, matmul_dtype, tiled_q):
    if tiled_q:
        xq_ref, xkv_ref, wq_ref, wkv_ref, wo_heads_ref, bo_ref, o_ref = refs
    else:
        xkv_ref, wq_ref, wkv_ref, wo_heads_ref, bo_ref, o_ref = refs
        xq_ref = None

    dim = n_heads * head_dim
    exact_softmax = (matmul_dtype == jnp.float32)
    scale = float(head_dim) ** -0.5

    # Cast activations once; matmuls run in matmul_dtype (bf16 by default) on
    # the MXU with f32 accumulation; softmax math stays f32.
    x_kv = xkv_ref[0].astype(matmul_dtype)                              # (N, D)
    x_q = xq_ref[0].astype(matmul_dtype) if tiled_q else x_kv           # (TQ, D)
    tq = x_q.shape[0]

    # Fused projections: one (TQ,D)@(D,D) for Q (1/sqrt(hd) folded in once)
    # and a single (N,D)@(D,2D) for K|V (fills the MXU output dim).
    q = (jnp.dot(x_q, wq_ref[...], preferred_element_type=jnp.float32)
         * scale).astype(matmul_dtype)                                  # (TQ, D)
    kv = jnp.dot(x_kv, wkv_ref[...],
                 preferred_element_type=jnp.float32).astype(matmul_dtype)  # (N, 2D)

    # Per-head attention; n_heads is small and static.  The output projection
    # is accumulated per head, so no lane-axis concatenate is needed.
    acc = jnp.zeros((tq, dim), jnp.float32)
    for h in range(n_heads):
        lo = h * head_dim
        q_h = q[:, lo:lo + head_dim]                                    # (TQ, hd)
        k_h = kv[:, lo:lo + head_dim]                                   # (N,  hd)
        v_h = kv[:, dim + lo:dim + lo + head_dim]                       # (N,  hd)

        s = lax.dot_general(q_h, k_h, (((1,), (1,)), ((), ())),
                            preferred_element_type=jnp.float32)         # (TQ, N)
        s = s - jnp.max(s, axis=-1, keepdims=True)
        p = jnp.exp(s)
        denom = jnp.sum(p, axis=-1, keepdims=True)
        if exact_softmax:
            attn = p / denom
        else:
            attn = p * pl.reciprocal(denom, approx=True)   # EUP slot, ~free
        attn = attn.astype(matmul_dtype)

        po_h = jnp.dot(attn, v_h, preferred_element_type=jnp.float32)   # (TQ, hd)
        acc = acc + jnp.dot(po_h.astype(matmul_dtype), wo_heads_ref[h],
                            preferred_element_type=jnp.float32)          # (TQ, D)

    o_ref[0] = (acc + bo_ref[...]).astype(o_ref.dtype)


def attention_qk(x, wq, wk, wv, wo, bo, *, n_heads,
                 matmul_dtype=jnp.bfloat16, q_tile=None):
    """Forward of Attention(attn_mode='qk') at eval time.

    x: (B, N, D).  wq/wk/wv/wo: (D, D) torch nn.Linear weights (out, in).
    bo: (D,) out_fc bias.  matmul_dtype: dtype of MXU operands (softmax and
    accumulation are always f32).
    """
    B, N, D = x.shape
    assert D % n_heads == 0, "dim must be divisible by n_heads"
    hd = D // n_heads

    # nn.Linear computes y = x @ W^T; pre-transpose / fuse weights here (glue).
    wq_t = wq.T.astype(matmul_dtype)                                     # (D, D)
    wkv_t = jnp.concatenate([wk.T, wv.T], axis=1).astype(matmul_dtype)   # (D, 2D)
    wo_heads = wo.T.reshape(n_heads, hd, D).astype(matmul_dtype)         # (H, hd, D)
    bo_2d = bo.reshape(1, D).astype(jnp.float32)

    tq = q_tile if q_tile is not None else _pick_q_tile(N)
    assert N % tq == 0, "q_tile must divide the sequence length"
    n_qt = N // tq
    tiled = n_qt > 1

    kernel = functools.partial(_attention_kernel, n_heads=n_heads, head_dim=hd,
                               matmul_dtype=matmul_dtype, tiled_q=tiled)

    if tiled:
        grid = (B, n_qt)
        in_specs = [
            pl.BlockSpec((1, tq, D), lambda b, qi: (b, qi, 0)),       # x rows -> q
            pl.BlockSpec((1, N, D), lambda b, qi: (b, 0, 0)),         # full x -> k/v
            pl.BlockSpec((D, D), lambda b, qi: (0, 0)),               # Wq^T
            pl.BlockSpec((D, 2 * D), lambda b, qi: (0, 0)),           # [Wk^T | Wv^T]
            pl.BlockSpec((n_heads, hd, D), lambda b, qi: (0, 0, 0)),  # Wo^T per head
            pl.BlockSpec((1, D), lambda b, qi: (0, 0)),               # out bias
        ]
        out_specs = pl.BlockSpec((1, tq, D), lambda b, qi: (b, qi, 0))
        operands = (x, x, wq_t, wkv_t, wo_heads, bo_2d)
        dims = ("parallel", "parallel")
    else:
        grid = (B,)
        in_specs = [
            pl.BlockSpec((1, N, D), lambda b: (b, 0, 0)),             # x
            pl.BlockSpec((D, D), lambda b: (0, 0)),                   # Wq^T
            pl.BlockSpec((D, 2 * D), lambda b: (0, 0)),               # [Wk^T | Wv^T]
            pl.BlockSpec((n_heads, hd, D), lambda b: (0, 0, 0)),      # Wo^T per head
            pl.BlockSpec((1, D), lambda b: (0, 0)),                   # out bias
        ]
        out_specs = pl.BlockSpec((1, N, D), lambda b: (b, 0, 0))
        operands = (x, wq_t, wkv_t, wo_heads, bo_2d)
        dims = ("parallel",)

    flops = int(B * (4 * N * D * D            # q + output projections
                     + 4 * N * D * D * n_qt   # fused k/v projection per q tile
                     + 4 * N * N * D))        # scores + attn@v across heads
    transcendentals = int(B * n_heads * N * N)
    w_bytes = int((wq_t.size + wkv_t.size + wo_heads.size) * wq_t.dtype.itemsize)
    bytes_accessed = int(2 * B * N * D * x.dtype.itemsize + w_bytes
                         + bo_2d.size * 4)

    return pl.pallas_call(
        kernel,
        out_shape=jax.ShapeDtypeStruct((B, N, D), x.dtype),
        grid_spec=pltpu.PrefetchScalarGridSpec(
            num_scalar_prefetch=0,
            grid=grid,
            in_specs=in_specs,
            out_specs=out_specs,
        ),
        compiler_params=pltpu.CompilerParams(dimension_semantics=dims),
        cost_estimate=pl.CostEstimate(flops=flops,
                                      transcendentals=transcendentals,
                                      bytes_accessed=bytes_accessed),
    )(*operands)


def attention_qk_reference(x, wq, wk, wv, wo, bo, *, n_heads):
    """Pure-JAX f32 reference mirroring the PyTorch forward (attn_mode='qk')."""
    B, N, D = x.shape
    hd = D // n_heads

    def proj(w):
        y = jnp.einsum('bnd,ed->bne', x, w)                       # x @ W^T
        return y.reshape(B, N, n_heads, hd).transpose(0, 2, 1, 3)  # (B,H,N,hd)

    q, k, v = proj(wq), proj(wk), proj(wv)
    attn = jnp.einsum('bhnd,bhmd->bhnm', q, k) / jnp.sqrt(jnp.float32(hd))
    attn = jax.nn.softmax(attn, axis=-1)
    out = jnp.einsum('bhnm,bhmd->bhnd', attn, v)
    out = out.transpose(0, 2, 1, 3).reshape(B, N, D)
    out = jnp.einsum('bnd,ed->bne', out, wo) + bo
    return out


if __name__ == "__main__":
    # Small shapes consistent with the module: dim divisible by n_heads.
    B, N, D, H = 2, 8, 32, 4
    key = jax.random.PRNGKey(0)
    kx, kq, kk, kv, ko, kb, kx2 = jax.random.split(key, 7)

    x = jax.random.normal(kx, (B, N, D), dtype=jnp.float32)
    # Deterministic synthetic parameters (torch Linear layout: (out, in)).
    w_scale = 1.0 / jnp.sqrt(jnp.float32(D))
    wq = jax.random.normal(kq, (D, D), dtype=jnp.float32) * w_scale
    wk = jax.random.normal(kk, (D, D), dtype=jnp.float32) * w_scale
    wv = jax.random.normal(kv, (D, D), dtype=jnp.float32) * w_scale
    wo = jax.random.normal(ko, (D, D), dtype=jnp.float32) * w_scale
    bo = jax.random.normal(kb, (D,), dtype=jnp.float32) * 0.1

    ref = jax.block_until_ready(
        attention_qk_reference(x, wq, wk, wv, wo, bo, n_heads=H))

    # Exact-precision path (f32 MXU operands, exact softmax division).
    out_f32 = jax.block_until_ready(
        attention_qk(x, wq, wk, wv, wo, bo, n_heads=H,
                     matmul_dtype=jnp.float32))
    assert out_f32.shape == (B, N, D)
    assert jnp.allclose(out_f32, ref, atol=1e-4, rtol=1e-4), "f32 mismatch"

    # Fast path (bf16 MXU operands, f32 accumulation/softmax, approx recip).
    out_bf16 = jax.block_until_ready(
        attention_qk(x, wq, wk, wv, wo, bo, n_heads=H))
    assert jnp.allclose(out_bf16, ref, atol=5e-2, rtol=5e-2), "bf16 mismatch"

    # Query-tiled path (grid = (B, N//TQ)) used for long sequences.
    N2 = 16
    x2 = jax.random.normal(kx2, (B, N2, D), dtype=jnp.float32)
    ref2 = jax.block_until_ready(
        attention_qk_reference(x2, wq, wk, wv, wo, bo, n_heads=H))
    out_tiled = jax.block_until_ready(
        attention_qk(x2, wq, wk, wv, wo, bo, n_heads=H,
                     matmul_dtype=jnp.float32, q_tile=8))
    assert jnp.allclose(out_tiled, ref2, atol=1e-4, rtol=1e-4), "tiled mismatch"

    print("KERNEL_OK")
</pallas_src>

<mosaic_0001>
module attributes {stable_mosaic.version = 11 : i64} {
  func.func @_attention_kernel(%arg0: i32, %arg1: memref<1x8x32xf32, #tpu.memory_space<vmem>>, %arg2: memref<32x32xf32, #tpu.memory_space<vmem>>, %arg3: memref<32x64xf32, #tpu.memory_space<vmem>>, %arg4: memref<4x8x32xf32, #tpu.memory_space<vmem>>, %arg5: memref<1x32xf32, #tpu.memory_space<vmem>>, %arg6: memref<1x8x32xf32, #tpu.memory_space<vmem>>) attributes {dimension_semantics = [#tpu.dimension_semantics<parallel>], iteration_bounds = array<i64: 2>, scalar_prefetch = 0 : i64, scratch_operands = 0 : i64, tpu.core_type = #tpu.core_type<tc>, window_params = [{transform_indices = @transform_0, window_bounds = array<i64: 1, 8, 32>}, {pipeline_mode = #tpu.pipeline_mode<synchronous>, transform_indices = @transform_1, window_bounds = array<i64: 32, 32>}, {pipeline_mode = #tpu.pipeline_mode<synchronous>, transform_indices = @transform_2, window_bounds = array<i64: 32, 64>}, {pipeline_mode = #tpu.pipeline_mode<synchronous>, transform_indices = @transform_3, window_bounds = array<i64: 4, 8, 32>}, {pipeline_mode = #tpu.pipeline_mode<synchronous>, transform_indices = @transform_4, window_bounds = array<i64: 1, 32>}, {transform_indices = @transform_5, window_bounds = array<i64: 1, 8, 32>}]} {
    %c0 = arith.constant 0 : index
    %c0_0 = arith.constant 0 : index
    %c0_1 = arith.constant 0 : index
    %0 = vector.load %arg1[%c0, %c0_0, %c0_1] : memref<1x8x32xf32, #tpu.memory_space<vmem>>, vector<1x8x32xf32>
    %1 = vector.shape_cast %0 : vector<1x8x32xf32> to vector<8x32xf32>
    %c0_2 = arith.constant 0 : index
    %c0_3 = arith.constant 0 : index
    %2 = vector.load %arg2[%c0_2, %c0_3] : memref<32x32xf32, #tpu.memory_space<vmem>>, vector<32x32xf32>
    %cst = arith.constant dense<0.000000e+00> : vector<8x32xf32>
    %3 = tpu.matmul %1, %2, %cst {dimension_numbers = #tpu.dot_dimension_numbers<[1], [0], [0], [1], [0, 0, 1, 1], [], []>} : vector<8x32xf32>, vector<32x32xf32>, vector<8x32xf32> -> vector<8x32xf32>
    %cst_4 = arith.constant 0.353553385 : f32
    %4 = vector.broadcast %cst_4 : f32 to vector<8x32xf32>
    %5 = arith.mulf %3, %4 : vector<8x32xf32>
    %c0_5 = arith.constant 0 : index
    %c0_6 = arith.constant 0 : index
    %6 = vector.load %arg3[%c0_5, %c0_6] : memref<32x64xf32, #tpu.memory_space<vmem>>, vector<32x64xf32>
    %cst_7 = arith.constant dense<0.000000e+00> : vector<8x64xf32>
    %7 = tpu.matmul %1, %6, %cst_7 {dimension_numbers = #tpu.dot_dimension_numbers<[1], [0], [0], [1], [0, 0, 1, 1], [], []>} : vector<8x32xf32>, vector<32x64xf32>, vector<8x64xf32> -> vector<8x64xf32>
    %cst_8 = arith.constant 0.000000e+00 : f32
    %8 = vector.broadcast %cst_8 : f32 to vector<8x32xf32>
    %9 = vector.extract_strided_slice %5 {offsets = [0, 0], sizes = [8, 8], strides = [1, 1]} : vector<8x32xf32> to vector<8x8xf32>
    %10 = vector.extract_strided_slice %7 {offsets = [0, 0], sizes = [8, 8], strides = [1, 1]} : vector<8x64xf32> to vector<8x8xf32>
    %11 = vector.extract_strided_slice %7 {offsets = [0, 32], sizes = [8, 8], strides = [1, 1]} : vector<8x64xf32> to vector<8x8xf32>
    %cst_9 = arith.constant dense<0.000000e+00> : vector<8x8xf32>
    %12 = tpu.matmul %9, %10, %cst_9 {dimension_numbers = #tpu.dot_dimension_numbers<[1], [1], [0], [0], [0, 0, 1, 0], [], []>} : vector<8x8xf32>, vector<8x8xf32>, vector<8x8xf32> -> vector<8x8xf32>
    %cst_10 = arith.constant dense<0xFF800000> : vector<8xf32>
    %13 = vector.multi_reduction <maximumf>, %12, %cst_10 [1] : vector<8x8xf32> to vector<8xf32>
    %14 = vector.shape_cast %13 : vector<8xf32> to vector<8x1xf32>
    %15 = vector.broadcast %14 : vector<8x1xf32> to vector<8x8xf32>
    %16 = arith.subf %12, %15 : vector<8x8xf32>
    %17 = math.exp %16 : vector<8x8xf32>
    %cst_11 = arith.constant dense<0.000000e+00> : vector<8xf32>
    %18 = vector.multi_reduction <add>, %17, %cst_11 [1] : vector<8x8xf32> to vector<8xf32>
    %19 = vector.shape_cast %18 : vector<8xf32> to vector<8x1xf32>
    %20 = vector.broadcast %19 : vector<8x1xf32> to vector<8x8xf32>
    %21 = arith.divf %17, %20 : vector<8x8xf32>
    %cst_12 = arith.constant dense<0.000000e+00> : vector<8x8xf32>
    %22 = tpu.matmul %21, %11, %cst_12 {dimension_numbers = #tpu.dot_dimension_numbers<[1], [0], [0], [1], [0, 0, 1, 1], [], []>} : vector<8x8xf32>, vector<8x8xf32>, vector<8x8xf32> -> vector<8x8xf32>
    %c0_13 = arith.constant 0 : index
    %c0_14 = arith.constant 0 : index
    %c0_15 = arith.constant 0 : index
    %23 = vector.load %arg4[%c0_13, %c0_14, %c0_15] : memref<4x8x32xf32, #tpu.memory_space<vmem>>, vector<1x8x32xf32>
    %24 = vector.shape_cast %23 : vector<1x8x32xf32> to vector<8x32xf32>
    %cst_16 = arith.constant dense<0.000000e+00> : vector<8x32xf32>
    %25 = tpu.matmul %22, %24, %cst_16 {dimension_numbers = #tpu.dot_dimension_numbers<[1], [0], [0], [1], [0, 0, 1, 1], [], []>} : vector<8x8xf32>, vector<8x32xf32>, vector<8x32xf32> -> vector<8x32xf32>
    %26 = arith.addf %8, %25 : vector<8x32xf32>
    %27 = vector.extract_strided_slice %5 {offsets = [0, 8], sizes = [8, 8], strides = [1, 1]} : vector<8x32xf32> to vector<8x8xf32>
    %28 = vector.extract_strided_slice %7 {offsets = [0, 8], sizes = [8, 8], strides = [1, 1]} : vector<8x64xf32> to vector<8x8xf32>
    %29 = vector.extract_strided_slice %7 {offsets = [0, 40], sizes = [8, 8], strides = [1, 1]} : vector<8x64xf32> to vector<8x8xf32>
    %cst_17 = arith.constant dense<0.000000e+00> : vector<8x8xf32>
    %30 = tpu.matmul %27, %28, %cst_17 {dimension_numbers = #tpu.dot_dimension_numbers<[1], [1], [0], [0], [0, 0, 1, 0], [], []>} : vector<8x8xf32>, vector<8x8xf32>, vector<8x8xf32> -> vector<8x8xf32>
    %cst_18 = arith.constant dense<0xFF800000> : vector<8xf32>
    %31 = vector.multi_reduction <maximumf>, %30, %cst_18 [1] : vector<8x8xf32> to vector<8xf32>
    %32 = vector.shape_cast %31 : vector<8xf32> to vector<8x1xf32>
    %33 = vector.broadcast %32 : vector<8x1xf32> to vector<8x8xf32>
    %34 = arith.subf %30, %33 : vector<8x8xf32>
    %35 = math.exp %34 : vector<8x8xf32>
    %cst_19 = arith.constant dense<0.000000e+00> : vector<8xf32>
    %36 = vector.multi_reduction <add>, %35, %cst_19 [1] : vector<8x8xf32> to vector<8xf32>
    %37 = vector.shape_cast %36 : vector<8xf32> to vector<8x1xf32>
    %38 = vector.broadcast %37 : vector<8x1xf32> to vector<8x8xf32>
    %39 = arith.divf %35, %38 : vector<8x8xf32>
    %cst_20 = arith.constant dense<0.000000e+00> : vector<8x8xf32>
    %40 = tpu.matmul %39, %29, %cst_20 {dimension_numbers = #tpu.dot_dimension_numbers<[1], [0], [0], [1], [0, 0, 1, 1], [], []>} : vector<8x8xf32>, vector<8x8xf32>, vector<8x8xf32> -> vector<8x8xf32>
    %c1 = arith.constant 1 : index
    %c0_21 = arith.constant 0 : index
    %c0_22 = arith.constant 0 : index
    %41 = vector.load %arg4[%c1, %c0_21, %c0_22] : memref<4x8x32xf32, #tpu.memory_space<vmem>>, vector<1x8x32xf32>
    %42 = vector.shape_cast %41 : vector<1x8x32xf32> to vector<8x32xf32>
    %cst_23 = arith.constant dense<0.000000e+00> : vector<8x32xf32>
    %43 = tpu.matmul %40, %42, %cst_23 {dimension_numbers = #tpu.dot_dimension_numbers<[1], [0], [0], [1], [0, 0, 1, 1], [], []>} : vector<8x8xf32>, vector<8x32xf32>, vector<8x32xf32> -> vector<8x32xf32>
    %44 = arith.addf %26, %43 : vector<8x32xf32>
    %45 = vector.extract_strided_slice %5 {offsets = [0, 16], sizes = [8, 8], strides = [1, 1]} : vector<8x32xf32> to vector<8x8xf32>
    %46 = vector.extract_strided_slice %7 {offsets = [0, 16], sizes = [8, 8], strides = [1, 1]} : vector<8x64xf32> to vector<8x8xf32>
    %47 = vector.extract_strided_slice %7 {offsets = [0, 48], sizes = [8, 8], strides = [1, 1]} : vector<8x64xf32> to vector<8x8xf32>
    %cst_24 = arith.constant dense<0.000000e+00> : vector<8x8xf32>
    %48 = tpu.matmul %45, %46, %cst_24 {dimension_numbers = #tpu.dot_dimension_numbers<[1], [1], [0], [0], [0, 0, 1, 0], [], []>} : vector<8x8xf32>, vector<8x8xf32>, vector<8x8xf32> -> vector<8x8xf32>
    %cst_25 = arith.constant dense<0xFF800000> : vector<8xf32>
    %49 = vector.multi_reduction <maximumf>, %48, %cst_25 [1] : vector<8x8xf32> to vector<8xf32>
    %50 = vector.shape_cast %49 : vector<8xf32> to vector<8x1xf32>
    %51 = vector.broadcast %50 : vector<8x1xf32> to vector<8x8xf32>
    %52 = arith.subf %48, %51 : vector<8x8xf32>
    %53 = math.exp %52 : vector<8x8xf32>
    %cst_26 = arith.constant dense<0.000000e+00> : vector<8xf32>
    %54 = vector.multi_reduction <add>, %53, %cst_26 [1] : vector<8x8xf32> to vector<8xf32>
    %55 = vector.shape_cast %54 : vector<8xf32> to vector<8x1xf32>
    %56 = vector.broadcast %55 : vector<8x1xf32> to vector<8x8xf32>
    %57 = arith.divf %53, %56 : vector<8x8xf32>
    %cst_27 = arith.constant dense<0.000000e+00> : vector<8x8xf32>
    %58 = tpu.matmul %57, %47, %cst_27 {dimension_numbers = #tpu.dot_dimension_numbers<[1], [0], [0], [1], [0, 0, 1, 1], [], []>} : vector<8x8xf32>, vector<8x8xf32>, vector<8x8xf32> -> vector<8x8xf32>
    %c2 = arith.constant 2 : index
    %c0_28 = arith.constant 0 : index
    %c0_29 = arith.constant 0 : index
    %59 = vector.load %arg4[%c2, %c0_28, %c0_29] : memref<4x8x32xf32, #tpu.memory_space<vmem>>, vector<1x8x32xf32>
    %60 = vector.shape_cast %59 : vector<1x8x32xf32> to vector<8x32xf32>
    %cst_30 = arith.constant dense<0.000000e+00> : vector<8x32xf32>
    %61 = tpu.matmul %58, %60, %cst_30 {dimension_numbers = #tpu.dot_dimension_numbers<[1], [0], [0], [1], [0, 0, 1, 1], [], []>} : vector<8x8xf32>, vector<8x32xf32>, vector<8x32xf32> -> vector<8x32xf32>
    %62 = arith.addf %44, %61 : vector<8x32xf32>
    %63 = vector.extract_strided_slice %5 {offsets = [0, 24], sizes = [8, 8], strides = [1, 1]} : vector<8x32xf32> to vector<8x8xf32>
    %64 = vector.extract_strided_slice %7 {offsets = [0, 24], sizes = [8, 8], strides = [1, 1]} : vector<8x64xf32> to vector<8x8xf32>
    %65 = vector.extract_strided_slice %7 {offsets = [0, 56], sizes = [8, 8], strides = [1, 1]} : vector<8x64xf32> to vector<8x8xf32>
    %cst_31 = arith.constant dense<0.000000e+00> : vector<8x8xf32>
    %66 = tpu.matmul %63, %64, %cst_31 {dimension_numbers = #tpu.dot_dimension_numbers<[1], [1], [0], [0], [0, 0, 1, 0], [], []>} : vector<8x8xf32>, vector<8x8xf32>, vector<8x8xf32> -> vector<8x8xf32>
    %cst_32 = arith.constant dense<0xFF800000> : vector<8xf32>
    %67 = vector.multi_reduction <maximumf>, %66, %cst_32 [1] : vector<8x8xf32> to vector<8xf32>
    %68 = vector.shape_cast %67 : vector<8xf32> to vector<8x1xf32>
    %69 = vector.broadcast %68 : vector<8x1xf32> to vector<8x8xf32>
    %70 = arith.subf %66, %69 : vector<8x8xf32>
    %71 = math.exp %70 : vector<8x8xf32>
    %cst_33 = arith.constant dense<0.000000e+00> : vector<8xf32>
    %72 = vector.multi_reduction <add>, %71, %cst_33 [1] : vector<8x8xf32> to vector<8xf32>
    %73 = vector.shape_cast %72 : vector<8xf32> to vector<8x1xf32>
    %74 = vector.broadcast %73 : vector<8x1xf32> to vector<8x8xf32>
    %75 = arith.divf %71, %74 : vector<8x8xf32>
    %cst_34 = arith.constant dense<0.000000e+00> : vector<8x8xf32>
    %76 = tpu.matmul %75, %65, %cst_34 {dimension_numbers = #tpu.dot_dimension_numbers<[1], [0], [0], [1], [0, 0, 1, 1], [], []>} : vector<8x8xf32>, vector<8x8xf32>, vector<8x8xf32> -> vector<8x8xf32>
    %c3 = arith.constant 3 : index
    %c0_35 = arith.constant 0 : index
    %c0_36 = arith.constant 0 : index
    %77 = vector.load %arg4[%c3, %c0_35, %c0_36] : memref<4x8x32xf32, #tpu.memory_space<vmem>>, vector<1x8x32xf32>
    %78 = vector.shape_cast %77 : vector<1x8x32xf32> to vector<8x32xf32>
    %cst_37 = arith.constant dense<0.000000e+00> : vector<8x32xf32>
    %79 = tpu.matmul %76, %78, %cst_37 {dimension_numbers = #tpu.dot_dimension_numbers<[1], [0], [0], [1], [0, 0, 1, 1], [], []>} : vector<8x8xf32>, vector<8x32xf32>, vector<8x32xf32> -> vector<8x32xf32>
    %80 = arith.addf %62, %79 : vector<8x32xf32>
    %c0_38 = arith.constant 0 : index
    %c0_39 = arith.constant 0 : index
    %81 = vector.load %arg5[%c0_38, %c0_39] : memref<1x32xf32, #tpu.memory_space<vmem>>, vector<1x32xf32>
    %82 = vector.broadcast %81 : vector<1x32xf32> to vector<8x32xf32>
    %83 = arith.addf %80, %82 : vector<8x32xf32>
    %c0_40 = arith.constant 0 : index
    %c0_41 = arith.constant 0 : index
    %c0_42 = arith.constant 0 : index
    %84 = vector.load %arg6[%c0_40, %c0_41, %c0_42] : memref<1x8x32xf32, #tpu.memory_space<vmem>>, vector<1x8x32xf32>
    %85 = vector.shape_cast %84 : vector<1x8x32xf32> to vector<8x32xf32>
    %86 = vector.shape_cast %83 : vector<8x32xf32> to vector<1x8x32xf32>
    tpu.vector_store %arg6[%c0_40, %c0_41, %c0_42], %86 {strides = array<i32>} : memref<1x8x32xf32, #tpu.memory_space<vmem>>, vector<1x8x32xf32>,
    return
  }
  func.func @transform_0(%arg0: i32) -> (i32, i32, i32) {
    %c0_i32 = arith.constant 0 : i32
    %c0_i32_0 = arith.constant 0 : i32
    %c0_i32_1 = arith.constant 0 : i32
    return %arg0, %c0_i32, %c0_i32_0 : i32, i32, i32
  }
  func.func @transform_1(%arg0: i32) -> (i32, i32) {
    %c0_i32 = arith.constant 0 : i32
    %c0_i32_0 = arith.constant 0 : i32
    %c0_i32_1 = arith.constant 0 : i32
    return %c0_i32, %c0_i32_0 : i32, i32
  }
  func.func @transform_2(%arg0: i32) -> (i32, i32) {
    %c0_i32 = arith.constant 0 : i32
    %c0_i32_0 = arith.constant 0 : i32
    %c0_i32_1 = arith.constant 0 : i32
    return %c0_i32, %c0_i32_0 : i32, i32
  }
  func.func @transform_3(%arg0: i32) -> (i32, i32, i32) {
    %c0_i32 = arith.constant 0 : i32
    %c0_i32_0 = arith.constant 0 : i32
    %c0_i32_1 = arith.constant 0 : i32
    %c0_i32_2 = arith.constant 0 : i32
    return %c0_i32, %c0_i32_0, %c0_i32_1 : i32, i32, i32
  }
  func.func @transform_4(%arg0: i32) -> (i32, i32) {
    %c0_i32 = arith.constant 0 : i32
    %c0_i32_0 = arith.constant 0 : i32
    %c0_i32_1 = arith.constant 0 : i32
    return %c0_i32, %c0_i32_0 : i32, i32
  }
  func.func @transform_5(%arg0: i32) -> (i32, i32, i32) {
    %c0_i32 = arith.constant 0 : i32
    %c0_i32_0 = arith.constant 0 : i32
    %c0_i32_1 = arith.constant 0 : i32
    return %arg0, %c0_i32, %c0_i32_0 : i32, i32, i32
  }
}

</mosaic_0001>

<bundles_post_ra>
// kernel: tpu_custom_call.1
= control target key start
LH: loop header
LB: loop body
LE: loop exit
PB: predicated region body
PF: predicated region fallthrough
CT: control target
= control target key end

     0   :  { %10 = vsyncpa [#allocation3], 0  ;;  %s1467_s0 = inlined_call_operand.hbm [shape: f32[2,8,32], index: 0, kind: input, shape index: {}]   ;;  %s1468_s1 = inlined_call_operand.hbm [shape: f32[32,32], index: 1, kind: input, shape index: {}]   ;;  %s1469_s2 = inlined_call_operand.hbm [shape: f32[32,64], index: 2, kind: input, shape index: {}]   ;;  %s1470_s3 = inlined_call_operand.hbm [shape: f32[4,8,32], index: 3, kind: input, shape index: {}]   ;;  %s1471_s4 = inlined_call_operand.vmem [shape: f32[1,32], index: 4, kind: input, shape index: {}]   ;;  %s1472_s5 = inlined_call_operand.hbm [shape: f32[2,8,32], index: 5, kind: output, shape index: {}]  }
   0x1   :  { %12 = vsyncpa [#allocation3 + $0x1], 0 }
   0x2   :  { %13 = vsyncpa [#allocation6], 0 }
   0x3   :  { %14 = vsyncpa [#allocation9], 0 }
   0x4   :  { %15 = vsyncpa [#allocation4], 0 }
   0x5   :  { %17 = vsyncpa [#allocation4 + $0x1], 0  ;;  %s1256_s18 = smov 0   ;;  %s1258_s19 = smov 0  }
   0x6   :  { %s1260_s20 = smov 0   ;;  %s1262_s21 = smov 0  }
   0x7 LB: > { %s175_s24 = sshll.u32 %s1468_s1, 4  ;;  %s1280_s25 = sadd.s32 4294967295, %s1212_s21   ;;  %s1212_s21 = sphi %s1262_s21, %s1483_s21   ;;  %s1208_s20 = sphi %s1260_s20, %s1482_s20   ;;  %s1204_s19 = sphi %s1258_s19, %s1481_s19   ;;  %s1200_s18 = sphi %s1256_s18, %s1480_s18   ;;  %s176_s24 = int_to_ptr.hbm [resolvable:$true] %s175_s24 }
   0x8   : > { %p880_p0 = scmp.ge.s32.totalorder %s1212_s21, 1  ;;  %p44_p1 = scmp.eq.s32.totalorder %s1280_s25, 0 }
   0x9   : > { %p164_p2 = scmp.lt.s32.totalorder %s1212_s21, 3  ;;  %s1214_s27 = smov [#allocation5]  }
   0xa   : > { %s177_s28 = sshll.u32 %s1214_s27, 4  ;;  %s189_s6 = sshll.u32 %s1469_s2, 4  ;;  %s178_s28 = int_to_ptr.vmem [resolvable:$true] %s177_s28  ;;  %s190_s6 = int_to_ptr.hbm [resolvable:$true] %s189_s6 }
   0xb   : > { %p1285_p3 = pnand %p880_p0, %p164_p2  ;;  %s203_s10 = sshll.u32 %s1470_s3, 4  ;;  %s204_s10 = int_to_ptr.hbm [resolvable:$true] %s203_s10 }
   0xc   : > { %s1215_s11 = smov [#allocation7]   ;;  %s1216_s13 = smov 128  }
   0xd   : > { %p931_p4 = pneg %p1285_p3  ;;  %s191_s12 = sshll.u32 %s1215_s11, 4  ;;  %s192_s12 = int_to_ptr.vmem [resolvable:$true] %s191_s12 }
   0xe   : > { %s1217_s14 = smov 8   ;;  %s1218_s15 = smov [#allocation8]  }
   0xf   : > { %p1297_p6 = pnand %p931_p4, %p44_p1  ;;  %s205_s16 = sshll.u32 %s1218_s15, 4  ;;  %s206_s16 = int_to_ptr.vmem [resolvable:$true] %s205_s16 }
  0x10   : > { %s879_s17 = sadd.s32 4294967294, %s1212_s21   ;;  %s1312_s22 = sadd.s32 1, %s1212_s21  }
  0x11   : > { %934 = dma.hbm_to_vmem [thread:$0]  (!%p1297_p6), %s176_s24, 512, %s178_s28, [#allocation6], %s1216_s13, %s1216_s13, %s1217_s14  }
  0x12   : > { %937 = dma.hbm_to_vmem [thread:$0]  (!%p1297_p6), %s190_s6, 512, %s192_s12, [#allocation6], %s1216_s13, %s1216_s13, %s1217_s14  }
  0x13   : > { %940 = dma.hbm_to_vmem [thread:$0]  (!%p1297_p6), %s204_s10, 512, %s206_s16, [#allocation9], %s1216_s13, %s1216_s13, %s1217_s14  }
  0x14   : > { %s30_s23 = sadd.s32 1, %s1208_s20  ;;  %s27_s24 = ssub.s32 %s1212_s21, %s1312_s22 }
  0x15   : > { %p37_p7 = scmp.ne.s32.totalorder %s1208_s20, %s1204_s19  ;;  %p28_p8 = scmp.eq.s32.totalorder %s27_s24, 0 }
  0x16   : > { %p38_p9 = scmp.eq.s32.totalorder %s1212_s21, 0  ;;  %p43_p10 = scmp.ne.s32.totalorder %s1204_s19, %s1200_s18 }
  0x17   : > { %p151_p11 = scmp.eq.s32.totalorder %s1280_s25, 1  ;;  %p157_p0 = scmp.eq.s32.totalorder %s879_s17, 1 }
  0x18   : > { %s1324_s27 = scalar_select %p28_p8, %s1208_s20, %s30_s23  }
  0x19   : > { %p1328_p12 = por %p44_p1, %p43_p10  ;;  %p1332_p13 = por %p151_p11, %p37_p7 }
  0x1a   : > { %p39_p2 = por %p38_p9, %p37_p7  ;;  %s222_s30 = sand.u32 1, %s1208_s20  }
  0x1b   : > { %p1337_p4 = por %p157_p0, %p43_p10  ;;  %p952_p6 = scmp.lt.s32.totalorder %s1212_s21, 2 }
  0x1c   : > { %s885_s7 = sshll.u32 %s222_s30, 3  ;;  %s886_s8 = sshll.u32 %s1212_s21, 3 }
  0x1d   : > { %s230_s11 = scalar_lea.hbm %s1467_s0, %s886_s8  ;;  %s226_s13 = scalar_lea.vmem [#allocation2], %s885_s7 }
  0x1e   : > { %s232_s12 = sshll.u32 %s230_s11, 4  ;;  %s234_s14 = sshll.u32 %s226_s13, 4  ;;  %s233_s12 = int_to_ptr.hbm [resolvable:$true] %s232_s12  ;;  %s235_s14 = int_to_ptr.vmem [resolvable:$true] %s234_s14 }
  0x1f   : > { %p1346_p8 = pnand %p952_p6, %p39_p2  ;;  %s223_s16 = scalar_lea.sflag [#allocation3], %s222_s30 }
  0x20   : > { %s1108_s17 = sshra.s32 %s233_s12, 4  ;;  %s1115_s7 = scalar_lea.hbm %s1467_s0, 16  ;;  %s1109_s17 = int_to_ptr.hbm [resolvable:$true] %s1108_s17 }
  0x21   : > { %s1110_s23 = scalar_lea.hbm %s1109_s17, 8  ;;  %p1112_p9 = pneg %p1346_p8 }
  0x22   : > { %p1111_p7 = scmp.ne.s32.totalorder %s1109_s17, %s1110_s23  ;;  %p1116_p0 = scmp.lt.s32.totalorder %s1109_s17, %s1467_s0 }
  0x23   : > { %p1117_p2 = scmp.lt.s32.totalorder %s1115_s7, %s1110_s23 }
  0x24   : > { %p1113_p10 = pnand %p1112_p9, %p1111_p7 }
  0x25   : > { %p1118_p6 = por %p1117_p2, %p1116_p0 }
  0x26   : > { %p1114_p11 = pneg %p1113_p10 }
  0x28   : > { %p1119_p5 = pnand %p1118_p6, %p1114_p11 }
  0x2a   : > { %1122 = shalt.err (!%p1119_p5)
}
  0x2b   : > { %944 = dma.hbm_to_vmem [thread:$0]  (!%p1346_p8), %s233_s12, 128, %s235_s14, %s223_s16  }
  0x2c   : > { %243 = sbr.rel (%p1285_p3) target bundleno = 1399 (0x577), region = 40  ;;  %s1363_s30 = sand.u32 (!%p1285_p3), 1, %s1204_s19  }
  0x2d   : > { %s888_s11 = sshll.u32 (!%p1285_p3), %s1363_s30, 3  ;;  %s246_s13 = scalar_lea.sflag (!%p1285_p3), [#allocation3], %s1363_s30 }
  0x2e   : > { %s249_s17 = scalar_lea.vmem (!%p1285_p3), [#allocation2], %s888_s11 }
  0x31   : > { %1183 = dma.done.wait (%p1328_p12), %s246_s13, 128  }
  0x32   : > { %1185 = vsyncadd (%p1328_p12), %s246_s13, 4294967168 }
  0x33   : > { %1187 = dma.done.wait (%p44_p1), [#allocation6], 1024  }
  0x34   : > { %1189 = vsyncadd (%p44_p1), [#allocation6], 4294966272 }
  0x35   : > { %1191 = dma.done.wait (%p44_p1), [#allocation9], 512  }
  0x36   : > { %1193 = vsyncadd (%p44_p1), [#allocation9], 4294966784  ;;  %v296_v0 = vld [vmem:[#allocation5 + $0x18] sm:$0xff]  ;;  %v295_v2 = vld [vmem:[#allocation5 + $0x10] sm:$0xff]  ;;  %vm297_vm0 = vcmask 261120   ;;  %vm346_vm1 = vcmask 64512  }
  0x37   : > { %v325_v1 = vld [vmem:[#allocation7 + $0x18] sm:$0xff]  ;;  %313 = vmatpush.msra.mxu0 %v296_v0  ;;  %v324_v3 = vld [vmem:[#allocation7 + $0x10] sm:$0xff]  ;;  %v294_v4 = vld [vmem:[#allocation5 + $0x8] sm:$0xff]  ;;  %s1219_s26 = smov 96   ;;  %s1220_s28 = smov 120  }
  0x38   : > { %338 = vmatpush.msra.mxu1 %v325_v1  ;;  %v323_v5 = vld [vmem:[#allocation7 + $0x8] sm:$0xff]  ;;  %v293_v6 = vld [vmem:[#allocation5] sm:$0xff]  ;;  %v292_v8 = vld [vmem:[%s249_s17] sm:$0xff]  ;;  %s1221_s12 = smov 112   ;;  %s1222_s14 = smov 104  }
  0x39   : > { %314 = vmatpush.msra.mxu0 %v295_v2  ;;  %v322_v7 = vld [vmem:[#allocation7] sm:$0xff]  ;;  %s1223_s15 = smov 72   ;;  %s1224_s16 = smov 80  }
  0x3a   : > { %339 = vmatpush.msra.mxu1 %v324_v3  ;;  %v423_v21 = vld [vmem:[#allocation8] sm:$0xff]  ;;  %s1225_s23 = smov 88   ;;  %s912_s24 = sshll.u32 %s1280_s25, 3 }
  0x3b   : > { %315 = vmatpush.msra.mxu0 %v294_v4  ;;  %s775_s9 = scalar_lea.hbm %s1472_s5, %s912_s24  ;;  %s291_s17 = scalar_lea.vmem [#allocation10], %s888_s11 }
  0x3c   : > { %340 = vmatpush.msra.mxu1 %v323_v5  ;;  %s765_s25 = scalar_lea.sflag [#allocation4], %s1363_s30  ;;  %s1158_s11 = scalar_lea.hbm %s1472_s5, 16 }
  0x3d   : > { %316 = vmatpush.msra.mxu0 %v293_v6 }
  0x3e   : > { %341 = vmatpush.msra.mxu1 %v322_v7  ;;  %893 = vmatmul.msk.f32.vlgmr.msra.gmra.mxu0 %vm297_vm0, %v292_v8 }
  0x3f   : > { %894 = vmatmul.msk.f32.vlgmr.msra.gmra.mxu1 %vm297_vm0, %v292_v8 }
  0x40   : > { %545 = vmatpush.msrb.mxu1 %v423_v21 }
  0xbb   : > { %v318_v9 = vpop.f32.mrf.mxu0 }
  0xbc   : > { %v1383_v10 = vpop.f32.mrf.mxu1  ;;  %v321_v11 = vmul.f32 0.35355338, %v318_v9 }
  0xbd   : > { %397 = vrot.lane.b32.xlu1 %v1383_v10, %s1219_s26  ;;  %895 = vmatpush.xpose.msk.msra.mxu2 %vm346_vm1, %v1383_v10  ;;  %s777_s26 = sshll.u32 %s291_s17, 4  ;;  %s778_s26 = int_to_ptr.vmem [resolvable:$true] %s777_s26 }
  0xbe   : > { %424 = vrot.lane.b32.xlu2 %v321_v11, %s1220_s28 }
  0xc0   : > { %896 = vmatmul.msk.f32.vlgmr.msra.gmra.mxu2 %vm346_vm1, %v321_v11 }
  0xc5   : > { %426 = vrot.lane.b32.xlu1 %v1383_v10, %s1220_s28  ;;  %s779_s28 = sshll.u32 %s775_s9, 4  ;;  %s780_s28 = int_to_ptr.hbm [resolvable:$true] %s779_s28 }
  0xc6   : > { %552 = vrot.lane.b32.xlu2 %v1383_v10, %s1221_s12 }
  0xcd   : > { %550 = vrot.lane.b32.xlu1 %v321_v11, %s1221_s12  ;;  %s1152_s12 = sshra.s32 %s780_s28, 4  ;;  %s1153_s12 = int_to_ptr.hbm [resolvable:$true] %s1152_s12 }
  0xce   : > { %654 = vrot.lane.b32.xlu2 %v321_v11, %s1222_s14  ;;  %p1159_p12 = scmp.lt.s32.totalorder %s1153_s12, %s1472_s5 }
 0x118   : > { %v425_v25 = vpop.permute.xlu2 %424 }
 0x120   : > { %v553_v36 = vpop.permute.xlu2 %552 }
 0x128   : > { %v655_v39 = vpop.permute.xlu2 %654 }
 0x12f   : > { %v398_v12 = vpop.permute.xlu1 %397 }
 0x130   : > { %418 = vmatpush.msra.mxu3 %v398_v12 }
 0x137   : > { %v427_v13 = vpop.permute.xlu1 %426 }
 0x138   : > { %898 = vmatpush.xpose.msk.msrb.mxu3 %vm346_vm1, %v427_v13 }
 0x13f   : > { %v551_v37 = vpop.permute.xlu1 %550 }
 0x143   : > { %v370_v14 = vpop.f32.mrf.mxu2 }
 0x144   : > { %v373_v15 = vsel %vm346_vm1, %v370_v14, -inf }
 0x145   : > { %374 = vmax.xlane.f32.xlu0 %v373_v15 }
 0x1b8   : > { %v375_v16 = vpop.xlane.xlu0 %374 }
 0x1b9   : > { %v376_v17 = vsub.f32 %v370_v14, %v375_v16 }
 0x1bb   : > { %v377_v18 = vmul.f32 1.442695, %v376_v17 }
 0x1bd   : > { %1002 = vpow2.f32 %v377_v18 }
 0x1c3   : > { %v1003_v19 = vpop.eup %1002 }
 0x1c4   : > { %v379_v20 = vsel %vm346_vm1, %v1003_v19, 0.0 }
 0x1c5   : > { %380 = vadd.xlane.f32.xlu0 %v379_v20 }
 0x1d9   : > { %656 = vrot.lane.b32.xlu0 %v1383_v10, %s1222_s14  ;;  %s1154_s14 = scalar_lea.hbm %s1153_s12, 8 }
 0x1da   : > { %p1155_p1 = scmp.ne.s32.totalorder %s1153_s12, %s1154_s14  ;;  %p1160_p8 = scmp.lt.s32.totalorder %s1158_s11, %s1154_s14 }
 0x1dc   : > { %p1156_p3 = pnand %p1155_p1, %p1332_p13  ;;  %p1161_p7 = por %p1160_p8, %p1159_p12 }
 0x1de   : > { %p1157_p5 = pneg %p1156_p3 }
 0x1e0   : > { %p1162_p9 = pnand %p1161_p7, %p1157_p5 }
 0x238   : > { %v381_v22 = vpop.xlane.xlu0 %380 }
 0x239   : > { %1004 = vrcp.f32 %v381_v22  ;;  %v393_v27 = vand.u32 2147483648, %v381_v22  ;;  %v391_v29 = vand.u32 2147483647, %v381_v22  ;;  %vm387_vm3 = vweird.f32 %v381_v22 }
 0x23b   : > { %v394_v31 = vor.u32 1.1754944e-38, %v393_v27  ;;  %vm392_vm5 = vcmp.eq.f32.partialorder %v391_v29, 8.507059e+37 }
 0x23f   : > { %v1005_v23 = vpop.eup %1004 }
 0x240   : > { %v383_v24 = vmul.f32 %v1005_v23, %v381_v22  ;;  %vm388_vm2 = vweird.f32 %v1005_v23 }
 0x241   : > { %vm389_vm4 = vmor %vm387_vm3, %vm388_vm2 }
 0x242   : > { %v384_v26 = vsub.f32 1.0, %v383_v24 }
 0x244   : > { %v385_v28 = vmul.f32 %v1005_v23, %v384_v26 }
 0x246   : > { %v386_v30 = vadd.f32 %v1005_v23, %v385_v28 }
 0x248   : > { %v390_v32 = vsel %vm389_vm4, %v1005_v23, %v386_v30 }
 0x249   : > { %v395_v33 = vsel %vm392_vm5, %v394_v31, %v390_v32 }
 0x24a   : > { %v396_v34 = vmul.f32 %v1003_v19, %v395_v33 }
 0x24b   : > { %v657_v35 = vpop.permute.xlu0 %656 }
 0x24c   : > { %897 = vmatmul.msk.f32.vlgmr.msra.gmra.mxu3 %vm346_vm1, %v396_v34  ;;  %907 = vmatpush.xpose.msk.msra.mxu1 %vm346_vm1, %v657_v35 }
 0x24d   : > { %903 = vmatpush.xpose.msk.msra.mxu3 %vm346_vm1, %v553_v36 }
 0x254   : > { %899 = vmatmul.msk.f32.vlgmr.msrb.gmra.mxu3 %vm346_vm1, %v425_v25 }
 0x25c   : > { %904 = vmatmul.msk.f32.vlgmr.msra.gmra.mxu3 %vm346_vm1, %v551_v37  ;;  %v733_v37 = vld [vmem:[#allocation8 + $0x18] sm:$0xff] }
 0x2cf   : > { %v420_v38 = vpop.f32.mrf.mxu3 }
 0x2d0   : > { %902 = vmatmul.msk.f32.vlgmr.msrb.gmra.mxu1 %vm346_vm1, %v420_v38  ;;  %v503_v38 = vld [vmem:[#allocation8 + $0x8] sm:$0xff] }
 0x2d1   : > { %522 = vmatpush.msrb.mxu0 %v503_v38 }
 0x2d7   : > { %v449_v40 = vpop.f32.mrf.mxu3 }
 0x2d8   : > { %908 = vmatmul.msk.f32.vlgmr.msra.gmra.mxu1 %vm346_vm1, %v655_v39  ;;  %v452_v41 = vsel %vm346_vm1, %v449_v40, -inf  ;;  %v629_v39 = vld [vmem:[#allocation8 + $0x10] sm:$0xff] }
 0x2d9   : > { %453 = vmax.xlane.f32.xlu1 %v452_v41  ;;  %648 = vmatpush.msra.mxu0 %v629_v39 }
 0x2df   : > { %v575_v42 = vpop.f32.mrf.mxu3 }
 0x2e0   : > { %v578_v43 = vsel %vm346_vm1, %v575_v42, -inf }
 0x2e1   : > { %579 = vmax.xlane.f32.xlu0 %v578_v43 }
 0x2f5   : > { %706 = vrot.lane.b32.xlu0 %v1383_v10, %s1223_s15 }
 0x34c   : > { %v454_v44 = vpop.xlane.xlu1 %453 }
 0x34d   : > { %v455_v45 = vsub.f32 %v449_v40, %v454_v44  ;;  %v1405_v46 = vpop.f32.mrf.mxu1 }
 0x34f   : > { %v456_v47 = vmul.f32 1.442695, %v455_v45 }
 0x351   : > { %1006 = vpow2.f32 %v456_v47 }
 0x354   : > { %v580_v48 = vpop.xlane.xlu0 %579 }
 0x355   : > { %v581_v49 = vsub.f32 %v575_v42, %v580_v48  ;;  %v679_v50 = vpop.f32.mrf.mxu1  ;;  %v1001_v48 = vld [vmem:[%s1471_s4] ss:$0 sm:$0xff] }
 0x356   : > { %v682_v51 = vsel %vm346_vm1, %v679_v50, -inf }
 0x357   : > { %683 = vmax.xlane.f32.xlu2 %v682_v51  ;;  %v582_v52 = vmul.f32 1.442695, %v581_v49  ;;  %v1408_v53 = vpop.eup %1006 }
 0x358   : > { %v458_v54 = vsel %vm346_vm1, %v1408_v53, 0.0 }
 0x359   : > { %1008 = vpow2.f32 %v582_v52 }
 0x35f   : > { %459 = vadd.xlane.f32.xlu2 %v458_v54  ;;  %v1412_v55 = vpop.eup %1008 }
 0x360   : > { %v584_v56 = vsel %vm346_vm1, %v1412_v55, 0.0 }
 0x367   : > { %585 = vadd.xlane.f32.xlu2 %v584_v56  ;;  %v707_v57 = vpop.permute.xlu0 %706 }
 0x368   : > { %727 = vmatpush.msrb.mxu3 %v707_v57 }
 0x37f   : > { %602 = vrot.lane.b32.xlu2 %v1383_v10, %s1224_s16 }
 0x3ca   : > { %v684_v58 = vpop.xlane.xlu2 %683 }
 0x3cb   : > { %v685_v59 = vsub.f32 %v679_v50, %v684_v58 }
 0x3cd   : > { %v686_v60 = vmul.f32 1.442695, %v685_v59 }
 0x3cf   : > { %1010 = vpow2.f32 %v686_v60 }
 0x3d2   : > { %v460_v63 = vpop.xlane.xlu2 %459 }
 0x3d3   : > { %1012 = vrcp.f32 %v460_v63  ;;  %v472_v17 = vand.u32 2147483648, %v460_v63  ;;  %vm466_vm10 = vweird.f32 %v460_v63  ;;  %v470_v19 = vand.u32 2147483647, %v460_v63 }
 0x3d5   : > { %v1011_v61 = vpop.eup %1010  ;;  %v473_v25 = vor.u32 1.1754944e-38, %v472_v17  ;;  %vm471_vm13 = vcmp.eq.f32.partialorder %v470_v19, 8.507059e+37 }
 0x3d6   : > { %v688_v62 = vsel %vm346_vm1, %v1011_v61, 0.0 }
 0x3d7   : > { %689 = vadd.xlane.f32.xlu1 %v688_v62 }
 0x3d9   : > { %v1013_v1 = vpop.eup %1012 }
 0x3da   : > { %v586_v0 = vpop.xlane.xlu2 %585  ;;  %v462_v3 = vmul.f32 %v1013_v1, %v460_v63  ;;  %vm467_vm7 = vweird.f32 %v1013_v1 }
 0x3db   : > { %1014 = vrcp.f32 %v586_v0  ;;  %vm468_vm12 = vmor %vm466_vm10, %vm467_vm7  ;;  %v598_v28 = vand.u32 2147483648, %v586_v0  ;;  %vm592_vm15 = vweird.f32 %v586_v0  ;;  %v596_v29 = vand.u32 2147483647, %v586_v0 }
 0x3dc   : > { %v463_v5 = vsub.f32 1.0, %v462_v3 }
 0x3dd   : > { %v599_v34 = vor.u32 1.1754944e-38, %v598_v28  ;;  %vm597_vm3 = vcmp.eq.f32.partialorder %v596_v29, 8.507059e+37 }
 0x3de   : > { %v464_v8 = vmul.f32 %v1013_v1, %v463_v5 }
 0x3e1   : > { %v1015_v4 = vpop.eup %1014 }
 0x3e2   : > { %v588_v9 = vmul.f32 %v1015_v4, %v586_v0  ;;  %vm593_vm14 = vweird.f32 %v1015_v4  ;;  %v603_v33 = vpop.permute.xlu2 %602 }
 0x3e3   : > { %vm594_vm2 = vmor %vm592_vm15, %vm593_vm14 }
 0x3e4   : > { %v589_v15 = vsub.f32 1.0, %v588_v9 }
 0x3e6   : > { %v590_v22 = vmul.f32 %v1015_v4, %v589_v15 }
 0x3e8   : > { %v591_v27 = vadd.f32 %v1015_v4, %v590_v22 }
 0x3ea   : > { %v595_v32 = vsel %vm594_vm2, %v1015_v4, %v591_v27 }
 0x3eb   : > { %v600_v35 = vsel %vm597_vm3, %v599_v34, %v595_v32 }
 0x3ec   : > { %v601_v36 = vmul.f32 %v1412_v55, %v600_v35 }
 0x3f0   : > { %476 = vrot.lane.b32.xlu1 %v1383_v10, %s1225_s23  ;;  %v465_v10 = vadd.f32 %v1013_v1, %v464_v8 }
 0x3f2   : > { %v469_v24 = vsel %vm468_vm12, %v1013_v1, %v465_v10 }
 0x3f3   : > { %v474_v26 = vsel %vm471_vm13, %v473_v25, %v469_v24 }
 0x3f4   : > { %v475_v31 = vmul.f32 %v1408_v53, %v474_v26 }
 0x44a   : > { %v690_v2 = vpop.xlane.xlu1 %689 }
 0x44b   : > { %1016 = vrcp.f32 %v690_v2  ;;  %v702_v12 = vand.u32 2147483648, %v690_v2  ;;  %v700_v14 = vand.u32 2147483647, %v690_v2  ;;  %vm696_vm8 = vweird.f32 %v690_v2 }
 0x44d   : > { %v703_v18 = vor.u32 1.1754944e-38, %v702_v12  ;;  %vm701_vm11 = vcmp.eq.f32.partialorder %v700_v14, 8.507059e+37 }
 0x451   : > { %v1017_v6 = vpop.eup %1016 }
 0x452   : > { %v692_v7 = vmul.f32 %v1017_v6, %v690_v2  ;;  %vm697_vm6 = vweird.f32 %v1017_v6 }
 0x453   : > { %vm698_vm9 = vmor %vm696_vm8, %vm697_vm6 }
 0x454   : > { %v693_v11 = vsub.f32 1.0, %v692_v7 }
 0x456   : > { %v694_v13 = vmul.f32 %v1017_v6, %v693_v11 }
 0x458   : > { %v695_v16 = vadd.f32 %v1017_v6, %v694_v13 }
 0x45a   : > { %v699_v20 = vsel %vm698_vm9, %v1017_v6, %v695_v16 }
 0x45b   : > { %v704_v21 = vsel %vm701_vm11, %v703_v18, %v699_v20 }
 0x45c   : > { %v705_v23 = vmul.f32 %v1011_v61, %v704_v21 }
 0x45e   : > { %909 = vmatmul.msk.f32.vlgmr.msrb.gmra.mxu3 %vm346_vm1, %v705_v23 }
 0x462   : > { %v477_v30 = vpop.permute.xlu1 %476 }
 0x463   : > { %497 = vmatpush.msrb.mxu2 %v477_v30 }
 0x464   : > { %900 = vmatmul.msk.f32.vlgmr.msrb.gmra.mxu2 %vm346_vm1, %v475_v31 }
 0x465   : > { %623 = vmatpush.msra.mxu2 %v603_v33 }
 0x467   : > { %752 = vmatpush.msrb.mxu2 %v733_v37 }
 0x46c   : > { %905 = vmatmul.msk.f32.vlgmr.msra.gmra.mxu2 %vm346_vm1, %v601_v36 }
 0x4e1   : > { %v729_v40 = vpop.f32.mrf.mxu3 }
 0x4e2   : > { %910 = vmatmul.msk.f32.vlgmr.msrb.gmra.mxu2 %vm346_vm1, %v729_v40 }
 0x4e7   : > { %v499_v41 = vpop.f32.mrf.mxu2 }
 0x4e8   : > { %901 = vmatmul.msk.f32.vlgmr.msrb.gmra.mxu0 %vm346_vm1, %v499_v41 }
 0x4ef   : > { %v625_v42 = vpop.f32.mrf.mxu2 }
 0x4f0   : > { %906 = vmatmul.msk.f32.vlgmr.msra.gmra.mxu0 %vm346_vm1, %v625_v42 }
 0x565   : > { %v524_v43 = vpop.f32.mrf.mxu0  ;;  %v754_v49 = vpop.f32.mrf.mxu2 }
 0x566   : > { %v548_v44 = vadd.f32 %v1405_v46, %v524_v43 }
 0x56d   : > { %v650_v45 = vpop.f32.mrf.mxu0 }
 0x56e   : > { %v653_v47 = vadd.f32 %v650_v45, %v548_v44 }
 0x570   : > { %v757_v50 = vadd.f32 %v754_v49, %v653_v47 }
 0x572   : > { %v762_v51 = vadd.f32 %v1001_v48, %v757_v50 }
 0x574   : > { %763 = vst.msk [vmem:[%s291_s17] sm:$0xff] %vm297_vm0, %v762_v51 }
 0x575   : > { %1165 = shalt.err (!%p1162_p9)
}
 0x576   : > { %929 = dma.vmem_to_hbm [thread:$0]  (%p1332_p13), %s778_s26, 128, %s780_s28, %s765_s25  }
 0x577 PF: > { %s791_s30 = sand.u32 1, %s1200_s18   ;;  %p1479_p10 = scmp.ge.s32.totalorder %s1212_s21, 2 }
 0x578   : > { %s792_s8 = scalar_lea.sflag [#allocation4], %s791_s30 }
 0x579   : > { %p946_p11 = pnand %p1479_p10, %p1337_p4 }
 0x57b   : > { %p947_p0 = pneg %p946_p11 }
 0x57d   : > { %1195 = dma.done.wait (%p947_p0), %s792_s8, 128  }
 0x57e   : > { %1197 = vsyncadd (%p947_p0), %s792_s8, 4294967168  ;;  %p20_p2 = scmp.ge.s32.totalorder %s1312_s22, 4   ;;  %s1480_s18 = smov %s1204_s19 }
 0x57f   : > { %s1481_s19 = smov %s1208_s20  ;;  %s1482_s20 = smov %s1324_s27 }
 0x580   : > { %s1483_s21 = smov %s1312_s22  ;;  %22 = sbr.rel (!%p20_p2) target bundleno = 7 (0x7), region = 100 }
 0x585   :  { %798 = vsyncpa [#allocation3], 1 }
 0x586   :  { %800 = vsyncpa [#allocation3 + $0x1], 1 }
 0x587   :  { %801 = vsyncpa [#allocation6], 1 }
 0x588   :  { %802 = vsyncpa [#allocation9], 1 }
 0x589   :  { %803 = vsyncpa [#allocation4], 1 }
 0x58a   :  { %805 = vsyncpa [#allocation4 + $0x1], 1 }

</bundles_post_ra>
